<compile_context>
chip_gen: v7x
topology: tpu7x:2x2x1
jax: 0.10.0
libtpu: 0.0.40
codegen_flags: <defaults>
</compile_context>

<pallas_src>
import numpy as np
import jax
import jax.numpy as jnp
from jax import lax
from jax.experimental import pallas as pl
from jax.experimental.pallas import tpu as pltpu

LAMBDA_CLS = 1.0
LAMBDA_PTS = 5.0
NUM_CLASSES = 3  # == predictions.size(-1); used by the .view(-1, 3) in PyTorch

try:  # fast C Hungarian if scipy is present
    from scipy.optimize import linear_sum_assignment as _lsa
except Exception:  # pragma: no cover
    _lsa = None


# ----------------------------- Pallas kernel -----------------------------

def _cost_cls_kernel(pts_pred_ref, pts_tgt_ref, logits_ref, tcls_ref,
                     cost_ref, cls_ref):
    """Fused single-step kernel:
       (a) pairwise L2 cost matrix, lane-dense [B, G, P] (P on lanes),
       (b) cross-entropy classification loss over the .view(-1, 3) logits.
       Pure VPU/EUP broadcast math; K=2 contractions cannot amortize MXU
       push/drain so no matmul form is used."""
    pp = pts_pred_ref[...]                                  # [2, B, P]
    pt = pts_tgt_ref[...]                                   # [2, B, G]
    px, py = pp[0], pp[1]                                   # [B, P]
    tx, ty = pt[0], pt[1]                                   # [B, G]

    # cost[b, g, p] = || pred[b, p] - gt[b, g] ||_2  (larger P axis on lanes)
    dx = tx[:, :, None] - px[:, None, :]                    # [B, G, P]
    dy = ty[:, :, None] - py[:, None, :]
    cost_ref[...] = jnp.sqrt(dx * dx + dy * dy)

    # cross-entropy, lane-dense logits [C, N] with N = B*P/C on lanes
    logits = logits_ref[...]                                # [C, N] f32
    tcls = tcls_ref[...]                                    # [1, N] int32
    m = jnp.max(logits, axis=0, keepdims=True)              # [1, N]
    lse = m + jnp.log(jnp.sum(jnp.exp(logits - m), axis=0, keepdims=True))
    cls_iota = lax.broadcasted_iota(jnp.int32, logits.shape, 0)   # [C, N]
    picked = jnp.sum(jnp.where(cls_iota == tcls, logits, 0.0),
                     axis=0, keepdims=True)                 # [1, N]
    per_sample = lse - picked                               # [1, N]
    n = per_sample.shape[1]
    cls_ref[...] = jnp.sum(per_sample, axis=1, keepdims=True) * (1.0 / n)


# --------------------------- device-side wrapper ---------------------------

@jax.jit
def _device_cost_and_cls(predictions, targets):
    """All pre-matching device work (prep + fused Pallas kernel) in one jitted
    executable so the strided slices / reshapes don't pay eager dispatch."""
    preds = predictions.astype(jnp.float32)
    tgts = targets.astype(jnp.float32)
    B, P, C = preds.shape
    G = tgts.shape[1]

    pts_pred = jnp.transpose(preds[:, :, 1:], (2, 0, 1))    # [2, B, P]
    pts_tgt = jnp.transpose(tgts[:, :, 1:], (2, 0, 1))      # [2, B, G]
    logits_t = preds[:, :, 0].reshape(-1, C).T              # [C, N]
    tcls = tgts[:, :, 0].reshape(1, -1).astype(jnp.int32)   # [1, N]

    vmem = pl.BlockSpec(memory_space=pltpu.MemorySpace.VMEM)  # whole-array blocks
    cost_gp, cls = pl.pallas_call(
        _cost_cls_kernel,
        out_shape=(jax.ShapeDtypeStruct((B, G, P), jnp.float32),
                   jax.ShapeDtypeStruct((1, 1), jnp.float32)),
        in_specs=[vmem, vmem, vmem, vmem],
        out_specs=(vmem, vmem),
    )(pts_pred, pts_tgt, logits_t, tcls)
    return cost_gp, cls[0, 0]


# ------------------------- host-side Hungarian matching -------------------------

def _hungarian_rect(cost):
    """Min-cost assignment for an (n x m) matrix with n <= m.  Returns (rows, cols)."""
    n, m = cost.shape
    INF = float("inf")
    u = [0.0] * (n + 1)
    v = [0.0] * (m + 1)
    p = [0] * (m + 1)
    way = [0] * (m + 1)
    for i in range(1, n + 1):
        p[0] = i
        j0 = 0
        minv = [INF] * (m + 1)
        used = [False] * (m + 1)
        while True:
            used[j0] = True
            i0 = p[j0]
            delta = INF
            j1 = 0
            for j in range(1, m + 1):
                if not used[j]:
                    cur = cost[i0 - 1][j - 1] - u[i0] - v[j]
                    if cur < minv[j]:
                        minv[j] = cur
                        way[j] = j0
                    if minv[j] < delta:
                        delta = minv[j]
                        j1 = j
            for j in range(m + 1):
                if used[j]:
                    u[p[j]] += delta
                    v[j] -= delta
                else:
                    minv[j] -= delta
            j0 = j1
            if p[j0] == 0:
                break
        while True:
            j1 = way[j0]
            p[j0] = p[j1]
            j0 = j1
            if j0 == 0:
                break
    rows, cols = [], []
    for j in range(1, m + 1):
        if p[j] != 0:
            rows.append(p[j] - 1)
            cols.append(j - 1)
    return np.asarray(rows, dtype=np.int64), np.asarray(cols, dtype=np.int64)


def hungarian_matching(cost_matrix):
    """cost_matrix: np.ndarray [B, P, G] -> matches [B, P] int32 (unmatched -> 0)."""
    B, P, G = cost_matrix.shape
    matches = np.zeros((B, P), dtype=np.int32)
    for i in range(B):
        c = np.asarray(cost_matrix[i], dtype=np.float64)
        if _lsa is not None:
            rows, cols = _lsa(c)
        elif P <= G:
            rows, cols = _hungarian_rect(c)
        else:
            rows_t, cols_t = _hungarian_rect(c.T)   # rows_t: gts, cols_t: preds
            rows, cols = cols_t, rows_t
        matches[i, rows] = cols
    return matches


# ------------------------------- forward pass -------------------------------

def maptr_loss(predictions, targets, lambda_cls=LAMBDA_CLS, lambda_pts=LAMBDA_PTS):
    B, P, C = predictions.shape
    G = targets.shape[1]
    assert (B * P) % C == 0 and (B * P) // C == B * G, "shape consistency of .view(-1, 3)"

    # Device: cost matrix (lane-dense [B, G, P]) + cls loss in one fused call.
    cost_gp, cls_dev = _device_cost_and_cls(predictions, targets)

    # TODO(synk): Hungarian matching (scipy linear_sum_assignment) is sequential,
    # data-dependent control flow with no clean Pallas equivalent; run on host.
    cost_np, cls_loss = jax.device_get((cost_gp, cls_dev))
    cost_pg = np.asarray(cost_np).transpose(0, 2, 1)          # [B, P, G] view (free)
    matches = hungarian_matching(cost_pg)                      # [B, P]

    # pts loss directly from the matched squared L2 distances already on host:
    # MSE over [P, 2] per batch == mean_p(cost[p, match]^2) / 2, then mean over B.
    rows = np.arange(P)
    pts_loss = 0.0
    for i in range(B):
        d = cost_pg[i, rows, matches[i]].astype(np.float64)    # matched distances
        pts_loss += float(np.mean(d * d)) * 0.5
    pts_loss /= B

    total = float(lambda_cls) * float(cls_loss) + float(lambda_pts) * pts_loss
    return total, matches


# ------------------------------ numpy reference ------------------------------

def reference_loss(predictions, targets, matches, lambda_cls, lambda_pts):
    preds = np.asarray(predictions)
    tgts = np.asarray(targets)
    B, P, C = preds.shape
    logits = preds[:, :, 0].reshape(-1, C)
    tcls = tgts[:, :, 0].reshape(-1).astype(np.int64)
    m = logits.max(axis=1, keepdims=True)
    lse = m[:, 0] + np.log(np.exp(logits - m).sum(axis=1))
    cls = float(np.mean(lse - logits[np.arange(logits.shape[0]), tcls]))
    pred_pts = preds[:, :, 1:]
    tgt_pts = tgts[:, :, 1:]
    pts = 0.0
    for i in range(B):
        matched = tgt_pts[i, matches[i]]
        pts += float(np.mean((pred_pts[i] - matched) ** 2))
    pts /= B
    return lambda_cls * cls + lambda_pts * pts


if __name__ == "__main__":
    B, G = 2, 8
    P = 3 * G   # num_preds = 3 * num_gts so the module's .view(-1, 3) is consistent

    key = jax.random.PRNGKey(0)
    k1, k2, k3 = jax.random.split(key, 3)
    predictions = jax.random.normal(k1, (B, P, 3), dtype=jnp.float32)
    tgt_cls = jax.random.randint(k2, (B, G, 1), 0, NUM_CLASSES).astype(jnp.float32)
    tgt_xy = jax.random.normal(k3, (B, G, 2), dtype=jnp.float32)
    targets = jnp.concatenate([tgt_cls, tgt_xy], axis=-1)              # [B, G, 3]

    total, matches = maptr_loss(predictions, targets, LAMBDA_CLS, LAMBDA_PTS)
    total = jax.block_until_ready(total)

    ref = reference_loss(predictions, targets, matches, LAMBDA_CLS, LAMBDA_PTS)
    assert np.allclose(np.asarray(total), ref, rtol=1e-4, atol=1e-4), (float(total), ref)
    print("KERNEL_OK")
</pallas_src>

<mosaic_0001>
module attributes {stable_mosaic.version = 11 : i64} {
  func.func @_cost_cls_kernel(%arg0: memref<2x2x24xf32, #tpu.memory_space<vmem>>, %arg1: memref<2x2x8xf32, #tpu.memory_space<vmem>>, %arg2: memref<3x16xf32, #tpu.memory_space<vmem>>, %arg3: memref<1x16xi32, #tpu.memory_space<vmem>>, %arg4: memref<2x8x24xf32, #tpu.memory_space<vmem>>, %arg5: memref<1x1xf32, #tpu.memory_space<vmem>>) attributes {dimension_semantics = [], scalar_prefetch = 0 : i64, scratch_operands = 0 : i64, tpu.core_type = #tpu.core_type<tc>} {
    %c0 = arith.constant 0 : index
    %c0_0 = arith.constant 0 : index
    %c0_1 = arith.constant 0 : index
    %0 = vector.load %arg0[%c0, %c0_0, %c0_1] : memref<2x2x24xf32, #tpu.memory_space<vmem>>, vector<2x2x24xf32>
    %c0_2 = arith.constant 0 : index
    %c0_3 = arith.constant 0 : index
    %c0_4 = arith.constant 0 : index
    %1 = vector.load %arg1[%c0_2, %c0_3, %c0_4] : memref<2x2x8xf32, #tpu.memory_space<vmem>>, vector<2x2x8xf32>
    %2 = vector.extract_strided_slice %0 {offsets = [0, 0, 0], sizes = [1, 2, 24], strides = [1, 1, 1]} : vector<2x2x24xf32> to vector<1x2x24xf32>
    %3 = vector.shape_cast %2 : vector<1x2x24xf32> to vector<2x24xf32>
    %4 = vector.extract_strided_slice %0 {offsets = [1, 0, 0], sizes = [1, 2, 24], strides = [1, 1, 1]} : vector<2x2x24xf32> to vector<1x2x24xf32>
    %5 = vector.shape_cast %4 : vector<1x2x24xf32> to vector<2x24xf32>
    %6 = vector.extract_strided_slice %1 {offsets = [0, 0, 0], sizes = [1, 2, 8], strides = [1, 1, 1]} : vector<2x2x8xf32> to vector<1x2x8xf32>
    %7 = vector.shape_cast %6 : vector<1x2x8xf32> to vector<2x8xf32>
    %8 = vector.extract_strided_slice %1 {offsets = [1, 0, 0], sizes = [1, 2, 8], strides = [1, 1, 1]} : vector<2x2x8xf32> to vector<1x2x8xf32>
    %9 = vector.shape_cast %8 : vector<1x2x8xf32> to vector<2x8xf32>
    %10 = vector.shape_cast %7 : vector<2x8xf32> to vector<2x8x1xf32>
    %11 = vector.shape_cast %3 : vector<2x24xf32> to vector<2x1x24xf32>
    %12 = vector.broadcast %10 : vector<2x8x1xf32> to vector<2x8x24xf32>
    %13 = vector.broadcast %11 : vector<2x1x24xf32> to vector<2x8x24xf32>
    %14 = arith.subf %12, %13 : vector<2x8x24xf32>
    %15 = vector.shape_cast %9 : vector<2x8xf32> to vector<2x8x1xf32>
    %16 = vector.shape_cast %5 : vector<2x24xf32> to vector<2x1x24xf32>
    %17 = vector.broadcast %15 : vector<2x8x1xf32> to vector<2x8x24xf32>
    %18 = vector.broadcast %16 : vector<2x1x24xf32> to vector<2x8x24xf32>
    %19 = arith.subf %17, %18 : vector<2x8x24xf32>
    %20 = arith.mulf %14, %14 : vector<2x8x24xf32>
    %21 = arith.mulf %19, %19 : vector<2x8x24xf32>
    %22 = arith.addf %20, %21 : vector<2x8x24xf32>
    %23 = math.sqrt %22 : vector<2x8x24xf32>
    %c0_5 = arith.constant 0 : index
    %c0_6 = arith.constant 0 : index
    %c0_7 = arith.constant 0 : index
    %24 = vector.load %arg4[%c0_5, %c0_6, %c0_7] : memref<2x8x24xf32, #tpu.memory_space<vmem>>, vector<2x8x24xf32>
    tpu.vector_store %arg4[%c0_5, %c0_6, %c0_7], %23 {strides = array<i32>} : memref<2x8x24xf32, #tpu.memory_space<vmem>>, vector<2x8x24xf32>,
    %c0_8 = arith.constant 0 : index
    %c0_9 = arith.constant 0 : index
    %25 = vector.load %arg2[%c0_8, %c0_9] : memref<3x16xf32, #tpu.memory_space<vmem>>, vector<3x16xf32>
    %c0_10 = arith.constant 0 : index
    %c0_11 = arith.constant 0 : index
    %26 = vector.load %arg3[%c0_10, %c0_11] : memref<1x16xi32, #tpu.memory_space<vmem>>, vector<1x16xi32>
    %cst = arith.constant dense<0xFF800000> : vector<16xf32>
    %27 = vector.multi_reduction <maximumf>, %25, %cst [0] : vector<3x16xf32> to vector<16xf32>
    %28 = vector.shape_cast %27 : vector<16xf32> to vector<1x16xf32>
    %29 = vector.broadcast %28 : vector<1x16xf32> to vector<3x16xf32>
    %30 = arith.subf %25, %29 : vector<3x16xf32>
    %31 = math.exp %30 : vector<3x16xf32>
    %cst_12 = arith.constant dense<0.000000e+00> : vector<16xf32>
    %32 = vector.multi_reduction <add>, %31, %cst_12 [0] : vector<3x16xf32> to vector<16xf32>
    %33 = vector.shape_cast %32 : vector<16xf32> to vector<1x16xf32>
    %34 = math.log %33 : vector<1x16xf32>
    %35 = arith.addf %28, %34 : vector<1x16xf32>
    %36 = tpu.iota {dimensions = array<i32: 0>} : vector<3x16xi32>
    %37 = vector.broadcast %26 : vector<1x16xi32> to vector<3x16xi32>
    %38 = arith.cmpi eq, %36, %37 : vector<3x16xi32>
    %cst_13 = arith.constant 0.000000e+00 : f32
    %39 = vector.broadcast %cst_13 : f32 to vector<3x16xf32>
    %40 = arith.select %38, %25, %39 : vector<3x16xi1>, vector<3x16xf32>
    %cst_14 = arith.constant dense<0.000000e+00> : vector<16xf32>
    %41 = vector.multi_reduction <add>, %40, %cst_14 [0] : vector<3x16xf32> to vector<16xf32>
    %42 = vector.shape_cast %41 : vector<16xf32> to vector<1x16xf32>
    %43 = arith.subf %35, %42 : vector<1x16xf32>
    %cst_15 = arith.constant dense<0.000000e+00> : vector<1xf32>
    %44 = vector.multi_reduction <add>, %43, %cst_15 [1] : vector<1x16xf32> to vector<1xf32>
    %45 = vector.shape_cast %44 : vector<1xf32> to vector<1x1xf32>
    %cst_16 = arith.constant 6.250000e-02 : f32
    %46 = vector.broadcast %cst_16 : f32 to vector<1x1xf32>
    %47 = arith.mulf %45, %46 : vector<1x1xf32>
    %c0_17 = arith.constant 0 : index
    %c0_18 = arith.constant 0 : index
    %48 = vector.load %arg5[%c0_17, %c0_18] : memref<1x1xf32, #tpu.memory_space<vmem>>, vector<1x1xf32>
    tpu.vector_store %arg5[%c0_17, %c0_18], %47 {strides = array<i32>} : memref<1x1xf32, #tpu.memory_space<vmem>>, vector<1x1xf32>,
    return
  }
}

</mosaic_0001>

<bundles_post_ra>
// kernel: squeeze.3
= control target key start
LH: loop header
LB: loop body
LE: loop exit
PB: predicated region body
PF: predicated region fallthrough
CT: control target
= control target key end

     0   :  { %s66_s8 = smov 119   ;;  %vm7_vm0 = vcmask 23552   ;;  %s67_s11 = smov 122   ;;  %s117_s0 = inlined_call_operand.vmem [shape: f32[2,24,1], index: 0, kind: input, shape index: {}]   ;;  %s118_s1 = inlined_call_operand.vmem [shape: f32[16,3], index: 1, kind: output, shape index: {}]  }
   0x1   :  { %v4_v0 = vld [vmem:[%s117_s0] sm:$0x3]  ;;  %s65_s0 = smov 125   ;;  %s68_s12 = smov 116  }
   0x2   :  { %5 = vst [vmem:[#allocation0] sm:$0x3] %v4_v0  ;;  %s69_s13 = smov 113   ;;  %s70_s14 = smov 110  }
   0x3   :  { %s71_s15 = smov 107  }
   0x9   :  { %v9_v1 = vld [vmem:[#allocation0] sm:$0x3]  }
   0xa   :  { %v21_v2 = vld [vmem:[#allocation0] sm:$0x3]   ;;  %10 = vrot.lane.b32.xlu0 %v9_v1, %s65_s0 }
   0xb   :  { %22 = vrot.lane.b32.xlu1 %v21_v2, %s66_s8  ;;  %v15_v3 = vld [vmem:[#allocation0] sm:$0x3]  }
   0xc   :  { %v27_v4 = vld [vmem:[#allocation0] sm:$0x3]  }
   0xd   :  { %v6_v5 = vld [vmem:[#allocation0] sm:$0x3]  }
   0xe   :  { %8 = vst.msk [vmem:[%s118_s1] ss:$8 sm:$0x3] %vm7_vm0, %v6_v5   ;;  %16 = vrot.lane.b32.xlu0 %v15_v3, %s67_s11  ;;  %v33_v6 = vld [vmem:[#allocation0] sm:$0x3]  }
   0xf   :  { %28 = vrot.lane.b32.xlu1 %v27_v4, %s68_s12  ;;  %v39_v7 = vld [vmem:[#allocation0] sm:$0x3]  }
  0x10   :  { %v45_v8 = vld [vmem:[#allocation0] sm:$0x3]  }
  0x12   :  { %34 = vrot.lane.b32.xlu0 %v33_v6, %s69_s13 }
  0x13   :  { %40 = vrot.lane.b32.xlu1 %v39_v7, %s70_s14 }
  0x16   :  { %46 = vrot.lane.b32.xlu0 %v45_v8, %s71_s15 }
  0x7c   :  { %v11_v9 = vpop.permute.xlu0 %10  }
  0x7d   :  { %v23_v10 = vpop.permute.xlu1 %22   ;;  %51 = vst.msk [vmem:[%s118_s1 + $0x1] ss:$8 sm:$0x3] %vm7_vm0, %v11_v9  }
  0x7e   :  { %53 = vst.msk [vmem:[%s118_s1 + $0x3] ss:$8 sm:$0x3] %vm7_vm0, %v23_v10  }
  0x80   :  { %v17_v11 = vpop.permute.xlu0 %16  }
  0x81   :  { %v29_v12 = vpop.permute.xlu1 %28   ;;  %52 = vst.msk [vmem:[%s118_s1 + $0x2] ss:$8 sm:$0x3] %vm7_vm0, %v17_v11  }
  0x82   :  { %54 = vst.msk [vmem:[%s118_s1 + $0x4] ss:$8 sm:$0x3] %vm7_vm0, %v29_v12  }
  0x84   :  { %v35_v13 = vpop.permute.xlu0 %34  }
  0x85   :  { %v41_v14 = vpop.permute.xlu1 %40   ;;  %55 = vst.msk [vmem:[%s118_s1 + $0x5] ss:$8 sm:$0x3] %vm7_vm0, %v35_v13  }
  0x86   :  { %56 = vst.msk [vmem:[%s118_s1 + $0x6] ss:$8 sm:$0x3] %vm7_vm0, %v41_v14  }
  0x88   :  { %v47_v15 = vpop.permute.xlu0 %46  }
  0x89   :  { %57 = vst.msk [vmem:[%s118_s1 + $0x7] ss:$8 sm:$0x3] %vm7_vm0, %v47_v15  }

// kernel: _device_cost_and_cls.1
= control target key start
LH: loop header
LB: loop body
LE: loop exit
PB: predicated region body
PF: predicated region fallthrough
CT: control target
= control target key end

     0   :  { %11 = vsyncpa [#allocation3], 0  ;;  %v25_v0 = vlaneseq  ;;  %vm148_vm0 = vcmask 124928   ;;  %v286_v6 = vmov 1966171168   ;;  %s374_s0 = inlined_call_operand.vmem [shape: f32[2,2,24], index: 0, kind: input, shape index: {}]   ;;  %s375_s1 = inlined_call_operand.vmem [shape: f32[2,2,8], index: 1, kind: input, shape index: {}]   ;;  %s376_s2 = inlined_call_operand.vmem [shape: f32[3,16], index: 2, kind: input, shape index: {}]   ;;  %s377_s3 = inlined_call_operand.vmem [shape: s32[1,16], index: 3, kind: input, shape index: {}]   ;;  %s378_s4 = inlined_call_operand.hbm [shape: f32[2,8,24], index: 4, kind: output, shape index: {0}]   ;;  %s379_s5 = inlined_call_operand.hbm [shape: f32[1,1], index: 5, kind: output, shape index: {1}]  }
   0x1   :  { %v146_v1 = vld [vmem:[%s376_s2] sm:$0x7]  ;;  %v49_v7 = vunpack.c.l.s4 %v286_v6 }
   0x2   :  { %v24_v2 = vld [vmem:[%s375_s1 + $0x2] sm:$0x3]  ;;  %v26_v3 = vshrl.u32 %v25_v0, 7  ;;  %v23_v4 = vld [vmem:[%s375_s1] sm:$0x3]  ;;  %v149_v5 = vsel %vm148_vm0, %v146_v1, -inf }
   0x3   :  { %v150_v8 = vrot.slane %v149_v5, 4  ;;  %v223_v9 = vld.sshfl [vmem:[%s374_s0 + $0x2] sm:$0x11 pattern:$0x75316420]  ;;  %v50_v12 = vunpack.c.0.s8 %v49_v7 }
   0x4   :  { %v334_v10 = vsub.s32 0, %v26_v3  ;;  %v34_v11 = vsub.s32 1, %v26_v3 }
   0x5   :  { %12 = vsyncpa [#allocation5], 0  ;;  %v151_v13 = vmax.f32 %v149_v5, %v150_v8  ;;  %v222_v14 = vld.sshfl [vmem:[%s374_s0] sm:$0x11 pattern:$0x75316420]  ;;  %v96_v15 = vcombine.high %v223_v9, %v223_v9  ;;  %v53_v20 = vsub.s32 %v50_v12, %v26_v3 }
   0x6   :  { %v77_v16 = vrot.slane %v24_v2, %v334_v10  ;;  %v28_v17 = vrot.slane %v23_v4, %v334_v10  ;;  %v47_v18 = vcombine.high %v222_v14, %v222_v14  ;;  %v84_v21 = vrot.slane %v24_v2, %v34_v11  ;;  %v224_v36 = vld [vmem:[%s377_s3] ss:$0 sm:$0xff]  ;;  %s287_s3 = smov [#allocation2]  }
   0x7   :  { %v152_v19 = vrot.slane %v151_v13, 2  ;;  %v35_v22 = vrot.slane %v23_v4, %v34_v11  ;;  %v103_v24 = vrot.slane %v223_v9, %v53_v20  ;;  %v54_v25 = vrot.slane %v222_v14, %v53_v20  ;;  %s197_s27 = sshll.u32 %s287_s3, 4  ;;  %s198_s27 = int_to_ptr.vmem [resolvable:$true] %s197_s27 }
   0x8   :  { %79 = vbcast.lane.b32.xlu1 %v77_v16, 256  ;;  %30 = vbcast.lane.b32.xlu0 %v28_v17, 256  ;;  %v110_v26 = vrot.slane %v96_v15, %v53_v20  ;;  %v61_v27 = vrot.slane %v47_v18, %v53_v20  ;;  %vm175_vm1 = vcmp.eq.s32.totalorder %v26_v3, %v224_v36  ;;  %vm185_vm2 = vcmask 130048   ;;  %s238_s28 = scalar_lea.vmem %s198_s27, 256  ;;  %p243_p1 = scmp.lt.s32.totalorder %s198_s27, %s198_s27 }
   0x9   :  { %v153_v23 = vmax.f32 %v151_v13, %v152_v19  ;;  %v114_v29 = vrot.slane %v103_v24, %v334_v10  ;;  %v65_v30 = vrot.slane %v54_v25, %v334_v10  ;;  %v176_v37 = vsel %vm175_vm1, %v146_v1, 0.0  ;;  %p239_p0 = scmp.ne.s32.totalorder %s198_s27, %s238_s28  ;;  %p244_p2 = scmp.lt.s32.totalorder %s238_s28, %s238_s28 }
   0xa   :  { %v118_v31 = vrot.slane %v110_v26, %v334_v10  ;;  %v69_v32 = vrot.slane %v61_v27, %v334_v10  ;;  %v177_v41 = vsel %vm148_vm0, %v176_v37, 0.0  ;;  %vm143_vm5 = vcmask 195584  }
   0xb   :  { %v154_v28 = vrot.slane %v153_v23, 1  ;;  %v178_v43 = vrot.slane %v177_v41, 4  ;;  %p245_p3 = por %p244_p2, %p243_p1 }
   0xc   :  { %86 = vbcast.lane.b32.xlu1 %v84_v21, 256  ;;  %37 = vbcast.lane.b32.xlu0 %v35_v22, 256 }
   0xd   :  { %v155_v33 = vmax.f32 %v153_v23, %v154_v28  ;;  %v179_v46 = vadd.f32 %v178_v43, %v177_v41  ;;  %p246_p4 = pnand %p245_p3, %p239_p0 }
   0xf   :  { %v156_v34 = vsub.f32 %v146_v1, %v155_v33  ;;  %v180_v49 = vrot.slane %v179_v46, 2 }
  0x11   :  { %v157_v35 = vmul.f32 1.442695, %v156_v34  ;;  %v181_v50 = vadd.f32 %v180_v49, %v179_v46 }
  0x13   :  { %230 = vpow2.f32 %v157_v35  ;;  %v182_v51 = vrot.slane %v181_v50, 1 }
  0x15   :  { %v183_v54 = vadd.f32 %v182_v51, %v181_v50 }
  0x1d   :  { %v231_v38 = vpop.eup %230 }
  0x1e   :  { %v159_v39 = vsel %vm148_vm0, %v231_v38, 0.0 }
  0x1f   :  { %v160_v40 = vrot.slane %v159_v39, 4 }
  0x21   :  { %v161_v42 = vadd.f32 %v160_v40, %v159_v39 }
  0x23   :  { %v162_v44 = vrot.slane %v161_v42, 2 }
  0x25   :  { %v163_v45 = vadd.f32 %v162_v44, %v161_v42 }
  0x27   :  { %v164_v47 = vrot.slane %v163_v45, 1 }
  0x29   :  { %v165_v48 = vadd.f32 %v164_v47, %v163_v45 }
  0x2b   :  { %232 = vlog2.f32 %v165_v48 }
  0x35   :  { %v233_v52 = vpop.eup %232 }
  0x36   :  { %v167_v53 = vmul.f32 0.6931472, %v233_v52 }
  0x38   :  { %v168_v55 = vadd.f32 %v167_v53, %v155_v33 }
  0x3a   :  { %v184_v56 = vsub.f32 %v168_v55, %v183_v54 }
  0x3c   :  { %v186_v57 = vsel %vm185_vm2, %v184_v56, 0.0 }
  0x3d   :  { %187 = vadd.xlane.f32.xlu0 %v186_v57 }
  0x7a   :  { %v80_v58 = vpop.permute.xlu1 %79  ;;  %v31_v59 = vpop.permute.xlu0 %30 }
  0x7b   :  { %v121_v60 = vsub.f32 %v80_v58, %v114_v29  ;;  %v72_v61 = vsub.f32 %v31_v59, %v65_v30 }
  0x7d   :  { %v125_v62 = vmul.f32 %v121_v60, %v121_v60  ;;  %v123_v63 = vmul.f32 %v72_v61, %v72_v61 }
  0x7e   :  { %v87_v0 = vpop.permute.xlu1 %86  ;;  %v38_v1 = vpop.permute.xlu0 %37 }
  0x7f   :  { %v127_v2 = vadd.f32 %v125_v62, %v123_v63  ;;  %v122_v3 = vsub.f32 %v87_v0, %v118_v31  ;;  %v73_v4 = vsub.f32 %v38_v1, %v69_v32 }
  0x81   :  { %234 = vrsqrt.f32 %v127_v2  ;;  %v126_v5 = vmul.f32 %v122_v3, %v122_v3  ;;  %v124_v6 = vmul.f32 %v73_v4, %v73_v4  ;;  %vm131_vm3 = vcmp.eq.f32.partialorder %v127_v2, inf }
  0x82   :  { %v134_v9 = vand.u32 2147483648, %v127_v2  ;;  %vm133_vm4 = vcmp.eq.f32.partialorder %v127_v2, 0.0 }
  0x83   :  { %v128_v7 = vadd.f32 %v126_v5, %v124_v6 }
  0x85   :  { %236 = vrsqrt.f32 %v128_v7  ;;  %vm138_vm6 = vcmp.eq.f32.partialorder %v128_v7, inf  ;;  %v141_v14 = vand.u32 2147483648, %v128_v7  ;;  %vm140_vm7 = vcmp.eq.f32.partialorder %v128_v7, 0.0 }
  0x8b   :  { %v235_v8 = vpop.eup %234 }
  0x8c   :  { %v130_v10 = vmul.f32 %v235_v8, %v127_v2 }
  0x8e   :  { %v132_v11 = vsel %vm131_vm3, %v127_v2, %v130_v10 }
  0x8f   :  { %v237_v12 = vpop.eup %236  ;;  %v135_v13 = vsel %vm133_vm4, %v134_v9, %v132_v11 }
  0x90   :  { %v137_v15 = vmul.f32 %v237_v12, %v128_v7  ;;  %144 = vst.msk [vmem:[#allocation2] sm:$0xff] %vm143_vm5, %v135_v13 }
  0x92   :  { %v139_v16 = vsel %vm138_vm6, %v128_v7, %v137_v15 }
  0x93   :  { %v142_v17 = vsel %vm140_vm7, %v141_v14, %v139_v16 }
  0x94   :  { %145 = vst.msk [vmem:[#allocation2 + $0x8] sm:$0xff] %vm143_vm5, %v142_v17 }
  0x95   :  { %249 = shalt.err (!%p246_p4)
}
  0x96   :  { %s250_s6 = scalar_lea.hbm %s378_s4, 256 }
  0x97   :  { %p251_p5 = scmp.ne.s32.totalorder %s378_s4, %s250_s6  ;;  %p254_p6 = scmp.lt.u32.totalorder %s250_s6, %s378_s4 }
  0x99   :  { %p256_p7 = pnand %p254_p6, %p251_p5 }
  0x9b   :  { %259 = shalt.err (!%p256_p7)
}
  0x9c   :  { %s288_s11 = smov 128   ;;  %s289_s12 = smov 8   ;;  %vm190_vm8 = vcmask 0  }
  0x9d   :  { %203 = dma.vmem_to_hbm [thread:$0]  %s198_s27, 256, %s378_s4, [#allocation3], %s288_s11, %s288_s11, %s289_s12  }
  0x9e   :  { %s290_s15 = smov [#allocation4]  }
  0x9f   :  { %s210_s16 = sshll.u32 %s290_s15, 4  ;;  %s211_s16 = int_to_ptr.vmem [resolvable:$true] %s210_s16 }
  0xa0   :  { %s260_s17 = scalar_lea.vmem %s211_s16, 16  ;;  %s264_s18 = scalar_lea.vmem %s211_s16, 32 }
  0xa1   :  { %p261_p8 = scmp.ne.s32.totalorder %s211_s16, %s260_s17  ;;  %p265_p9 = scmp.lt.s32.totalorder %s211_s16, %s211_s16 }
  0xa2   :  { %p266_p10 = scmp.lt.s32.totalorder %s264_s18, %s260_s17 }
  0xa4   :  { %p267_p11 = por %p266_p10, %p265_p9 }
  0xa6   :  { %p268_p12 = pnand %p267_p11, %p261_p8 }
  0xca   :  { %v188_v18 = vpop.xlane.xlu0 %187 }
  0xcb   :  { %v189_v19 = vmul.f32 0.0625, %v188_v18 }
  0xcd   :  { %191 = vst.msk [vmem:[#allocation4] sm:$0x1] %vm190_vm8, %v189_v19 }
  0xce   :  { %271 = shalt.err (!%p268_p12)
}
  0xcf   :  { %s272_s21 = scalar_lea.hbm %s379_s5, 16 }
  0xd0   :  { %p273_p13 = scmp.ne.s32.totalorder %s379_s5, %s272_s21  ;;  %p276_p0 = scmp.lt.u32.totalorder %s272_s21, %s379_s5 }
  0xd2   :  { %p278_p1 = pnand %p276_p0, %p273_p13 }
  0xd4   :  { %281 = shalt.err (!%p278_p1)
}
  0xd5   :  { %213 = dma.vmem_to_hbm [thread:$0]  %s211_s16, 16, %s379_s5, [#allocation5]  }
  0xd6   :  { %282 = dma.done.wait [#allocation3], 256  }
  0xd7   :  { %283 = vsyncadd [#allocation3], 4294967040 }
  0xd8   :  { %284 = dma.done.wait [#allocation5], 16  }
  0xd9   :  { %285 = vsyncadd [#allocation5], 4294967280 }
  0xda   :  { %220 = vsyncpa [#allocation3], 1 }
  0xdb   :  { %221 = vsyncpa [#allocation5], 1 }

</bundles_post_ra>
